<compile_context>
chip_gen: v7x
topology: tpu7x:2x2x1
jax: 0.10.0
libtpu: 0.0.40
codegen_flags: <defaults>
</compile_context>

<pallas_src>
import functools

import jax
import jax.numpy as jnp
import numpy as np
from jax import lax
from jax.experimental import pallas as pl
from jax.experimental.pallas import tpu as pltpu


# ----------------------------------------------------------------------------
# Kernels
# ----------------------------------------------------------------------------
def _conv_stats_kernel(x_ref, b_ref, y_ref, stats_ref, *, ksize, tile_h,
                       tiles_per_step, num_w_blocks, lane_step, span_c, twoc,
                       predecimated):
    """Conv for one step (tiles_per_step packed row tiles) + BN partials.

    x_ref:     (tps, tile_h_in, Wp*Cin)        stride == 1
               (tps, K, tile_h, Wp*Cin)        stride  > 1 (pre-decimated rows)
    b_ref:     (K, span*Cin, tile_w*Cout)      w-blocked banded weight (bf16)
    y_ref:     (tps*tile_h, W_out*Cout)        conv output, lane-dense
    stats_ref: (1, 2, W_out*Cout)  row 0: per-column mean over this step's rows
                                   row 1: per-column sum of squared deviations
    """
    m_rows = tiles_per_step * tile_h
    wc = x_ref.shape[-1]

    # Stack all packed tiles once per kh tap so each MXU pass sees M = m_rows.
    rows = []
    for kh in range(ksize):
        if predecimated:
            r = x_ref[:, kh, :, :]
        else:
            r = x_ref[:, kh:kh + tile_h, :]
        rows.append(r.reshape(m_rows, wc))

    # W-blocked banded contraction: each ~128-lane output chunk only contracts
    # against its own span of input lanes (no full-width zero band).
    for j in range(num_w_blocks):
        lo = j * lane_step
        acc = jnp.zeros((m_rows, twoc), jnp.float32)
        for kh in range(ksize):
            lhs = rows[kh][:, lo:lo + span_c]
            acc = acc + jnp.dot(lhs, b_ref[kh],
                                preferred_element_type=jnp.float32)
        cl = j * twoc
        y_ref[:, cl:cl + twoc] = acc.astype(y_ref.dtype)

        # Centered BN partials from the f32 accumulator (Chan-combinable).
        mu = jnp.mean(acc, axis=0, keepdims=True)                 # (1, twoc)
        m2 = jnp.sum((acc - mu) * (acc - mu), axis=0, keepdims=True)
        stats_ref[0:1, 0:1, cl:cl + twoc] = mu[None]
        stats_ref[0:1, 1:2, cl:cl + twoc] = m2[None]


def _bn_act_kernel(y_ref, scale_ref, shift_ref, o_ref, *, act):
    """Per-block y * scale + shift, optional ReLU6, cast to output dtype."""
    out = y_ref[...].astype(jnp.float32) * scale_ref[...] + shift_ref[...]
    if act:
        out = jnp.clip(out, 0.0, 6.0)
    o_ref[...] = out.astype(o_ref.dtype)


# ----------------------------------------------------------------------------
# Wrapper helpers (static shape / layout glue)
# ----------------------------------------------------------------------------
def _pick_tile_w(w_out, cout):
    """Smallest divisor tile_w of w_out with tile_w*cout a multiple of 128."""
    for tw in range(1, w_out + 1):
        if w_out % tw == 0 and (tw * cout) % 128 == 0:
            return tw
    # TODO(synk): no lane-aligned split exists -> full width (masked stores).
    return w_out


def _pick_tile_h(h_out, row_bytes, vmem_budget=8 << 20):
    """Full image height unless the row slab is too big; else a multiple-of-8
    divisor of h_out that fits the budget."""
    if h_out * row_bytes <= vmem_budget:
        return h_out
    best = h_out
    for th in range(h_out - 1, 0, -1):
        if h_out % th or th % 8:
            continue
        best = th
        if th * row_bytes <= vmem_budget:
            break
    return best


def _pick_tiles_per_step(num_tiles, tile_h, target_m=256, min_steps=2):
    """Pack row tiles per grid step so the matmul M dim approaches target_m,
    keeping >= min_steps grid steps (megacore) and an (8,.)-legal out block."""
    legal = [t for t in range(1, num_tiles + 1)
             if num_tiles % t == 0
             and ((t * tile_h) % 8 == 0 or t == num_tiles)]
    best = legal[0]
    for t in legal:
        if t * tile_h <= target_m and num_tiles // t >= min_steps:
            best = max(best, t)
    return best


def _pick_rows_block(rows_total, target_rows=1024):
    """Row-block size for the memory-bound pass 2 (decoupled from tile_h)."""
    if rows_total <= target_rows:
        return rows_total
    for rb in range(target_rows, 7, -1):
        if rows_total % rb == 0 and rb % 8 == 0:
            return rb
    return rows_total


def _vmem_limit_bytes(block_bytes, headroom=8 << 20):
    """Generation-aware VMEM limit: ~48 MiB on v7x (64 MiB/TC), ~96 MiB on
    v5e/v6e (128 MiB)."""
    need = 2 * int(sum(block_bytes)) + headroom        # double-buffered bound
    try:
        cap = int(pltpu.get_tpu_info().vmem_capacity_bytes)
    except Exception:
        cap = 64 << 20                                 # assume the smallest gen
    budget = int(0.75 * cap)
    return int(min(max(need, 32 << 20), budget))


def _banded_weight_block(weight_oihw, *, ksize, stride, groups, tile_w):
    """B[kh, (w*stride+kw)*Cin + g*cing + c, w*Cout + g*coutg + o]
         = weight[g*coutg + o, c, kh, kw] for w in [0, tile_w); zeros elsewhere
       (groups handled by the zero structure)."""
    cout, cing, k, _ = weight_oihw.shape
    coutg = cout // groups
    cin = cing * groups
    span = (tile_w - 1) * stride + ksize
    span_c, twoc = span * cin, tile_w * cout

    # (g, o, c, kh, kw) -> (kh, kw, g, c, o), broadcast over the tile_w slots.
    wt = jnp.transpose(weight_oihw.reshape(groups, coutg, cing, k, k),
                       (3, 4, 0, 2, 1))
    vals = jnp.broadcast_to(wt[:, None],
                            (k, tile_w, k, groups, cing, coutg)).reshape(k, -1)

    w_ax = np.arange(tile_w)[:, None, None, None, None]
    kw_ax = np.arange(k)[None, :, None, None, None]
    g_ax = np.arange(groups)[None, None, :, None, None]
    c_ax = np.arange(cing)[None, None, None, :, None]
    o_ax = np.arange(coutg)[None, None, None, None, :]
    shape = (tile_w, k, groups, cing, coutg)
    rows = np.broadcast_to((w_ax * stride + kw_ax) * cin + g_ax * cing + c_ax,
                           shape).reshape(-1)
    cols = np.broadcast_to(w_ax * cout + g_ax * coutg + o_ax,
                           shape).reshape(-1)

    b = jnp.zeros((k, span_c, twoc), weight_oihw.dtype)
    return b.at[:, rows, cols].set(vals)


# ----------------------------------------------------------------------------
# ConvNormAct forward
# ----------------------------------------------------------------------------
def conv_norm_act(x_nchw, weight_oihw, gamma, beta, *, stride=1, groups=1,
                  act=True, norm=True, eps=1e-5, compute_dtype=jnp.bfloat16):
    """x: (N, Cin, H, W), weight: (Cout, Cin/groups, K, K) -> (N, Cout, Ho, Wo)."""
    n, cin, h, w = x_nchw.shape
    cout, cing, k, k2 = weight_oihw.shape
    assert k == k2 and cing * groups == cin and cout % groups == 0
    pad = k // 2
    h_out = (h + 2 * pad - k) // stride + 1
    w_out = (w + 2 * pad - k) // stride + 1
    hp, wp = h + 2 * pad, w + 2 * pad
    wc, woc = wp * cin, w_out * cout
    out_dtype = jnp.dtype(x_nchw.dtype)
    compute_dtype = jnp.dtype(compute_dtype)

    # ---- lane-dense folded, padded input: (N, Hp, Wp*Cin) ----
    x = jnp.transpose(x_nchw, (0, 2, 3, 1))                       # NHWC
    x = jnp.pad(x, ((0, 0), (pad, pad), (pad, pad), (0, 0)))
    x_fold = x.reshape(n, hp, wc)

    # ---- tiling decisions ----
    tile_h = _pick_tile_h(h_out, wc * compute_dtype.itemsize)
    num_h_tiles = h_out // tile_h
    num_tiles = n * num_h_tiles
    tiles_per_step = _pick_tiles_per_step(num_tiles, tile_h)
    num_steps = num_tiles // tiles_per_step
    m_rows = tiles_per_step * tile_h
    rows_total = num_tiles * tile_h                               # == n * h_out

    tile_w = _pick_tile_w(w_out, cout)
    num_w_blocks = w_out // tile_w
    span_c = ((tile_w - 1) * stride + k) * cin
    twoc = tile_w * cout
    lane_step = tile_w * stride * cin

    # ---- input row tiles ----
    if stride == 1:
        tile_h_in = tile_h + k - 1
        if tile_h == h_out:
            x_tiles = x_fold                 # full-height tile: no halo gather
        else:
            row_idx = (np.arange(num_h_tiles)[:, None] * tile_h
                       + np.arange(tile_h_in)[None, :]).astype(np.int32)
            x_tiles = jnp.take(x_fold, jnp.asarray(row_idx), axis=1)
            x_tiles = x_tiles.reshape(num_tiles, tile_h_in, wc)
        predecimated = False
        x_block = (tiles_per_step, tile_h_in, wc)
        x_index = lambda s: (s, 0, 0)
    else:
        # Pre-decimate rows so the kernel never does strided sublane reads.
        row_idx = (np.arange(num_h_tiles)[:, None, None] * (tile_h * stride)
                   + np.arange(k)[None, :, None]
                   + np.arange(tile_h)[None, None, :] * stride).astype(np.int32)
        x_tiles = jnp.take(x_fold, jnp.asarray(row_idx), axis=1)
        x_tiles = x_tiles.reshape(num_tiles, k, tile_h, wc)
        predecimated = True
        x_block = (tiles_per_step, k, tile_h, wc)
        x_index = lambda s: (s, 0, 0, 0)

    x_tiles = x_tiles.astype(compute_dtype)
    b = _banded_weight_block(weight_oihw, ksize=k, stride=stride, groups=groups,
                             tile_w=tile_w).astype(compute_dtype)

    # ---- pass 1: conv (+ centered BN partials), tiled & pipelined ----
    conv_kernel = functools.partial(
        _conv_stats_kernel, ksize=k, tile_h=tile_h,
        tiles_per_step=tiles_per_step, num_w_blocks=num_w_blocks,
        lane_step=lane_step, span_c=span_c, twoc=twoc,
        predecimated=predecimated)

    x_block_bytes = int(np.prod(x_block)) * compute_dtype.itemsize
    b_bytes = int(b.size) * compute_dtype.itemsize
    y_block_bytes = m_rows * woc * out_dtype.itemsize
    stats_block_bytes = 2 * woc * 4
    vmem1 = _vmem_limit_bytes(
        [x_block_bytes, b_bytes, y_block_bytes, stats_block_bytes])
    cost1 = pl.CostEstimate(
        flops=2 * num_steps * m_rows * k * num_w_blocks * span_c * twoc,
        transcendentals=0,
        bytes_accessed=(int(x_tiles.size) * compute_dtype.itemsize + b_bytes
                        + rows_total * woc * out_dtype.itemsize
                        + num_steps * 2 * woc * 4))

    def _run_pass1(single_buffer_b):
        if single_buffer_b:
            b_spec = pl.BlockSpec((k, span_c, twoc), lambda s: (0, 0, 0),
                                  pipeline_mode=pl.Buffered(1))
        else:
            b_spec = pl.BlockSpec((k, span_c, twoc), lambda s: (0, 0, 0))
        return pl.pallas_call(
            conv_kernel,
            out_shape=(jax.ShapeDtypeStruct((rows_total, woc), out_dtype),
                       jax.ShapeDtypeStruct((num_steps, 2, woc), jnp.float32)),
            grid=(num_steps,),
            in_specs=[pl.BlockSpec(x_block, x_index), b_spec],
            out_specs=(pl.BlockSpec((m_rows, woc), lambda s: (s, 0)),
                       pl.BlockSpec((1, 2, woc), lambda s: (s, 0, 0))),
            compiler_params=pltpu.CompilerParams(
                dimension_semantics=("parallel",),
                vmem_limit_bytes=vmem1),
            cost_estimate=cost1,
        )(x_tiles, b)

    try:
        # B's index_map is constant -> single-buffering it frees VMEM (v7x).
        y, stats = _run_pass1(True)
    except Exception:
        y, stats = _run_pass1(False)

    # ---- finalize BN stats (Chan's parallel combine, tiny, plain JAX) ----
    if norm:
        count = n * h_out * w_out
        mu_g = stats[:, 0, :].reshape(num_steps, w_out, cout)
        m2_g = stats[:, 1, :].reshape(num_steps, w_out, cout)
        mean = jnp.mean(mu_g, axis=(0, 1))        # equal per-group counts
        m2 = (jnp.sum(m2_g, axis=(0, 1))
              + m_rows * jnp.sum((mu_g - mean) ** 2, axis=(0, 1)))
        var = m2 / count                          # biased (training-mode) var
        scale = gamma.astype(jnp.float32) * lax.rsqrt(var + eps)
        shift = beta.astype(jnp.float32) - mean * scale
    else:
        scale = jnp.ones((cout,), jnp.float32)
        shift = jnp.zeros((cout,), jnp.float32)
    scale_fold = jnp.tile(scale, w_out).reshape(1, woc)
    shift_fold = jnp.tile(shift, w_out).reshape(1, woc)

    # ---- pass 2: normalize + ReLU6, large lane-dense blocks ----
    r_blk = _pick_rows_block(rows_total)
    num_r_blocks = rows_total // r_blk
    vmem2 = _vmem_limit_bytes([2 * r_blk * woc * out_dtype.itemsize,
                               2 * woc * 4])
    cost2 = pl.CostEstimate(
        flops=3 * rows_total * woc, transcendentals=0,
        bytes_accessed=2 * rows_total * woc * out_dtype.itemsize + 2 * woc * 4)
    out_fold = pl.pallas_call(
        functools.partial(_bn_act_kernel, act=act),
        out_shape=jax.ShapeDtypeStruct((rows_total, woc), out_dtype),
        grid=(num_r_blocks,),
        in_specs=[pl.BlockSpec((r_blk, woc), lambda t: (t, 0)),
                  pl.BlockSpec((1, woc), lambda t: (0, 0)),
                  pl.BlockSpec((1, woc), lambda t: (0, 0))],
        out_specs=pl.BlockSpec((r_blk, woc), lambda t: (t, 0)),
        compiler_params=pltpu.CompilerParams(
            dimension_semantics=("parallel",),
            vmem_limit_bytes=vmem2),
        cost_estimate=cost2,
    )(y, scale_fold, shift_fold)

    out = out_fold.reshape(n, h_out, w_out, cout)
    return jnp.transpose(out, (0, 3, 1, 2))                       # NCHW


if __name__ == "__main__":
    key = jax.random.PRNGKey(0)
    k_x, k_w = jax.random.split(key)

    # ConvNormAct(in_channels=4, out_channels=8, kernel_size=3)
    N, Cin, H, W = 2, 4, 16, 16
    Cout, K = 8, 3

    x = jax.random.normal(k_x, (N, Cin, H, W), jnp.float32)
    weight = jax.random.normal(k_w, (Cout, Cin, K, K), jnp.float32) * 0.1
    gamma = jnp.ones((Cout,), jnp.float32)        # BatchNorm2d default init
    beta = jnp.zeros((Cout,), jnp.float32)

    out = conv_norm_act(x, weight, gamma, beta, stride=1, groups=1)
    out = jax.block_until_ready(out)
    assert out.shape == (N, Cout, H, W), out.shape

    # Pure-JAX reference (PyTorch module semantics, training-mode BN).
    def reference(xr, wr):
        conv = lax.conv_general_dilated(
            xr, wr, window_strides=(1, 1), padding=[(1, 1), (1, 1)],
            dimension_numbers=("NCHW", "OIHW", "NCHW"),
            precision=lax.Precision.HIGHEST)
        mean = conv.mean(axis=(0, 2, 3), keepdims=True)
        var = ((conv - mean) ** 2).mean(axis=(0, 2, 3), keepdims=True)
        ref = (conv - mean) * lax.rsqrt(var + 1e-5)
        ref = ref * gamma.reshape(1, -1, 1, 1) + beta.reshape(1, -1, 1, 1)
        return jnp.clip(ref, 0.0, 6.0)

    # Strict check vs. a reference fed the same bf16-rounded operands the MXU
    # sees (accumulation is f32 in both), isolating kernel/BN-combine errors.
    ref_bf16 = reference(x.astype(jnp.bfloat16).astype(jnp.float32),
                         weight.astype(jnp.bfloat16).astype(jnp.float32))
    err_strict = float(jnp.max(jnp.abs(out - ref_bf16)))
    assert err_strict < 2e-3, f"strict max abs err {err_strict}"

    # Loose check vs. the full-f32 reference (difference = bf16 operand rounding).
    ref_f32 = reference(x, weight)
    err_f32 = float(jnp.max(jnp.abs(out - ref_f32)))
    assert err_f32 < 5e-2, f"f32-reference max abs err {err_f32}"

    print("KERNEL_OK")
</pallas_src>

<mosaic_0001>
module attributes {stable_mosaic.version = 11 : i64} {
  func.func @_conv_stats_kernel(%arg0: i32, %arg1: memref<1x18x72xbf16, #tpu.memory_space<vmem>>, %arg2: memref<3x72x128xbf16, #tpu.memory_space<vmem>>, %arg3: memref<16x128xf32, #tpu.memory_space<vmem>>, %arg4: memref<1x2x128xf32, #tpu.memory_space<vmem>>) attributes {dimension_semantics = [#tpu.dimension_semantics<parallel>], iteration_bounds = array<i64: 2>, scalar_prefetch = 0 : i64, scratch_operands = 0 : i64, tpu.core_type = #tpu.core_type<tc>, window_params = [{transform_indices = @transform_0, window_bounds = array<i64: 1, 18, 72>}, {pipeline_mode = #tpu.pipeline_mode<synchronous>, transform_indices = @transform_1, window_bounds = array<i64: 3, 72, 128>}, {transform_indices = @transform_2, window_bounds = array<i64: 16, 128>}, {transform_indices = @transform_3, window_bounds = array<i64: 1, 2, 128>}]} {
    %c0 = arith.constant 0 : index
    %c0_0 = arith.constant 0 : index
    %c0_1 = arith.constant 0 : index
    %0 = vector.load %arg1[%c0, %c0_0, %c0_1] : memref<1x18x72xbf16, #tpu.memory_space<vmem>>, vector<1x16x72xbf16>
    %1 = vector.shape_cast %0 : vector<1x16x72xbf16> to vector<16x72xbf16>
    %c0_2 = arith.constant 0 : index
    %c1 = arith.constant 1 : index
    %c0_3 = arith.constant 0 : index
    %2 = vector.load %arg1[%c0_2, %c1, %c0_3] : memref<1x18x72xbf16, #tpu.memory_space<vmem>>, vector<1x16x72xbf16>
    %3 = vector.shape_cast %2 : vector<1x16x72xbf16> to vector<16x72xbf16>
    %c0_4 = arith.constant 0 : index
    %c2 = arith.constant 2 : index
    %c0_5 = arith.constant 0 : index
    %4 = vector.load %arg1[%c0_4, %c2, %c0_5] : memref<1x18x72xbf16, #tpu.memory_space<vmem>>, vector<1x16x72xbf16>
    %5 = vector.shape_cast %4 : vector<1x16x72xbf16> to vector<16x72xbf16>
    %cst = arith.constant 0.000000e+00 : f32
    %6 = vector.broadcast %cst : f32 to vector<16x128xf32>
    %c0_6 = arith.constant 0 : index
    %c0_7 = arith.constant 0 : index
    %c0_8 = arith.constant 0 : index
    %7 = vector.load %arg2[%c0_6, %c0_7, %c0_8] : memref<3x72x128xbf16, #tpu.memory_space<vmem>>, vector<1x72x128xbf16>
    %8 = vector.shape_cast %7 : vector<1x72x128xbf16> to vector<72x128xbf16>
    %cst_9 = arith.constant dense<0.000000e+00> : vector<16x128xf32>
    %9 = tpu.matmul %1, %8, %cst_9 {dimension_numbers = #tpu.dot_dimension_numbers<[1], [0], [0], [1], [0, 0, 1, 1], [], []>} : vector<16x72xbf16>, vector<72x128xbf16>, vector<16x128xf32> -> vector<16x128xf32>
    %10 = arith.addf %6, %9 : vector<16x128xf32>
    %c1_10 = arith.constant 1 : index
    %c0_11 = arith.constant 0 : index
    %c0_12 = arith.constant 0 : index
    %11 = vector.load %arg2[%c1_10, %c0_11, %c0_12] : memref<3x72x128xbf16, #tpu.memory_space<vmem>>, vector<1x72x128xbf16>
    %12 = vector.shape_cast %11 : vector<1x72x128xbf16> to vector<72x128xbf16>
    %cst_13 = arith.constant dense<0.000000e+00> : vector<16x128xf32>
    %13 = tpu.matmul %3, %12, %cst_13 {dimension_numbers = #tpu.dot_dimension_numbers<[1], [0], [0], [1], [0, 0, 1, 1], [], []>} : vector<16x72xbf16>, vector<72x128xbf16>, vector<16x128xf32> -> vector<16x128xf32>
    %14 = arith.addf %10, %13 : vector<16x128xf32>
    %c2_14 = arith.constant 2 : index
    %c0_15 = arith.constant 0 : index
    %c0_16 = arith.constant 0 : index
    %15 = vector.load %arg2[%c2_14, %c0_15, %c0_16] : memref<3x72x128xbf16, #tpu.memory_space<vmem>>, vector<1x72x128xbf16>
    %16 = vector.shape_cast %15 : vector<1x72x128xbf16> to vector<72x128xbf16>
    %cst_17 = arith.constant dense<0.000000e+00> : vector<16x128xf32>
    %17 = tpu.matmul %5, %16, %cst_17 {dimension_numbers = #tpu.dot_dimension_numbers<[1], [0], [0], [1], [0, 0, 1, 1], [], []>} : vector<16x72xbf16>, vector<72x128xbf16>, vector<16x128xf32> -> vector<16x128xf32>
    %18 = arith.addf %14, %17 : vector<16x128xf32>
    %c0_18 = arith.constant 0 : index
    %c0_19 = arith.constant 0 : index
    %19 = vector.load %arg3[%c0_18, %c0_19] : memref<16x128xf32, #tpu.memory_space<vmem>>, vector<16x128xf32>
    tpu.vector_store %arg3[%c0_18, %c0_19], %18 {strides = array<i32>} : memref<16x128xf32, #tpu.memory_space<vmem>>, vector<16x128xf32>,
    %cst_20 = arith.constant dense<0.000000e+00> : vector<128xf32>
    %20 = vector.multi_reduction <add>, %18, %cst_20 [0] : vector<16x128xf32> to vector<128xf32>
    %21 = vector.shape_cast %20 : vector<128xf32> to vector<1x128xf32>
    %cst_21 = arith.constant 1.600000e+01 : f32
    %22 = vector.broadcast %cst_21 : f32 to vector<1x128xf32>
    %23 = arith.divf %21, %22 : vector<1x128xf32>
    %24 = vector.broadcast %23 : vector<1x128xf32> to vector<16x128xf32>
    %25 = arith.subf %18, %24 : vector<16x128xf32>
    %26 = vector.broadcast %23 : vector<1x128xf32> to vector<16x128xf32>
    %27 = arith.subf %18, %26 : vector<16x128xf32>
    %28 = arith.mulf %25, %27 : vector<16x128xf32>
    %cst_22 = arith.constant dense<0.000000e+00> : vector<128xf32>
    %29 = vector.multi_reduction <add>, %28, %cst_22 [0] : vector<16x128xf32> to vector<128xf32>
    %30 = vector.shape_cast %29 : vector<128xf32> to vector<1x128xf32>
    %31 = vector.shape_cast %23 : vector<1x128xf32> to vector<1x1x128xf32>
    %c0_23 = arith.constant 0 : index
    %c0_24 = arith.constant 0 : index
    %c0_25 = arith.constant 0 : index
    %32 = vector.load %arg4[%c0_23, %c0_24, %c0_25] : memref<1x2x128xf32, #tpu.memory_space<vmem>>, vector<1x1x128xf32>
    tpu.vector_store %arg4[%c0_23, %c0_24, %c0_25], %31 {strides = array<i32>} : memref<1x2x128xf32, #tpu.memory_space<vmem>>, vector<1x1x128xf32>,
    %33 = vector.shape_cast %30 : vector<1x128xf32> to vector<1x1x128xf32>
    %c0_26 = arith.constant 0 : index
    %c1_27 = arith.constant 1 : index
    %c0_28 = arith.constant 0 : index
    %34 = vector.load %arg4[%c0_26, %c1_27, %c0_28] : memref<1x2x128xf32, #tpu.memory_space<vmem>>, vector<1x1x128xf32>
    tpu.vector_store %arg4[%c0_26, %c1_27, %c0_28], %33 {strides = array<i32>} : memref<1x2x128xf32, #tpu.memory_space<vmem>>, vector<1x1x128xf32>,
    return
  }
  func.func @transform_0(%arg0: i32) -> (i32, i32, i32) {
    %c0_i32 = arith.constant 0 : i32
    %c0_i32_0 = arith.constant 0 : i32
    %c0_i32_1 = arith.constant 0 : i32
    return %arg0, %c0_i32, %c0_i32_0 : i32, i32, i32
  }
  func.func @transform_1(%arg0: i32) -> (i32, i32, i32) {
    %c0_i32 = arith.constant 0 : i32
    %c0_i32_0 = arith.constant 0 : i32
    %c0_i32_1 = arith.constant 0 : i32
    %c0_i32_2 = arith.constant 0 : i32
    return %c0_i32, %c0_i32_0, %c0_i32_1 : i32, i32, i32
  }
  func.func @transform_2(%arg0: i32) -> (i32, i32) {
    %c0_i32 = arith.constant 0 : i32
    %c0_i32_0 = arith.constant 0 : i32
    return %arg0, %c0_i32 : i32, i32
  }
  func.func @transform_3(%arg0: i32) -> (i32, i32, i32) {
    %c0_i32 = arith.constant 0 : i32
    %c0_i32_0 = arith.constant 0 : i32
    %c0_i32_1 = arith.constant 0 : i32
    return %arg0, %c0_i32, %c0_i32_0 : i32, i32, i32
  }
}

module attributes {stable_mosaic.version = 11 : i64} {
  func.func @_conv_stats_kernel(%arg0: i32, %arg1: memref<1x18x72xbf16, #tpu.memory_space<vmem>>, %arg2: memref<3x72x128xbf16, #tpu.memory_space<vmem>>, %arg3: memref<16x128xf32, #tpu.memory_space<vmem>>, %arg4: memref<1x2x128xf32, #tpu.memory_space<vmem>>) attributes {dimension_semantics = [#tpu.dimension_semantics<parallel>], iteration_bounds = array<i64: 2>, scalar_prefetch = 0 : i64, scratch_operands = 0 : i64, tpu.core_type = #tpu.core_type<tc>, window_params = [{transform_indices = @transform_0, window_bounds = array<i64: 1, 18, 72>}, {pipeline_mode = #tpu.pipeline_mode<synchronous>, transform_indices = @transform_1, window_bounds = array<i64: 3, 72, 128>}, {transform_indices = @transform_2, window_bounds = array<i64: 16, 128>}, {transform_indices = @transform_3, window_bounds = array<i64: 1, 2, 128>}]} {
    %c0 = arith.constant 0 : index
    %c0_0 = arith.constant 0 : index
    %c0_1 = arith.constant 0 : index
    %0 = vector.load %arg1[%c0, %c0_0, %c0_1] : memref<1x18x72xbf16, #tpu.memory_space<vmem>>, vector<1x16x72xbf16>
    %1 = vector.shape_cast %0 : vector<1x16x72xbf16> to vector<16x72xbf16>
    %c0_2 = arith.constant 0 : index
    %c1 = arith.constant 1 : index
    %c0_3 = arith.constant 0 : index
    %2 = vector.load %arg1[%c0_2, %c1, %c0_3] : memref<1x18x72xbf16, #tpu.memory_space<vmem>>, vector<1x16x72xbf16>
    %3 = vector.shape_cast %2 : vector<1x16x72xbf16> to vector<16x72xbf16>
    %c0_4 = arith.constant 0 : index
    %c2 = arith.constant 2 : index
    %c0_5 = arith.constant 0 : index
    %4 = vector.load %arg1[%c0_4, %c2, %c0_5] : memref<1x18x72xbf16, #tpu.memory_space<vmem>>, vector<1x16x72xbf16>
    %5 = vector.shape_cast %4 : vector<1x16x72xbf16> to vector<16x72xbf16>
    %cst = arith.constant 0.000000e+00 : f32
    %6 = vector.broadcast %cst : f32 to vector<16x128xf32>
    %c0_6 = arith.constant 0 : index
    %c0_7 = arith.constant 0 : index
    %c0_8 = arith.constant 0 : index
    %7 = vector.load %arg2[%c0_6, %c0_7, %c0_8] : memref<3x72x128xbf16, #tpu.memory_space<vmem>>, vector<1x72x128xbf16>
    %8 = vector.shape_cast %7 : vector<1x72x128xbf16> to vector<72x128xbf16>
    %cst_9 = arith.constant dense<0.000000e+00> : vector<16x128xf32>
    %9 = tpu.matmul %1, %8, %cst_9 {dimension_numbers = #tpu.dot_dimension_numbers<[1], [0], [0], [1], [0, 0, 1, 1], [], []>} : vector<16x72xbf16>, vector<72x128xbf16>, vector<16x128xf32> -> vector<16x128xf32>
    %10 = arith.addf %6, %9 : vector<16x128xf32>
    %c1_10 = arith.constant 1 : index
    %c0_11 = arith.constant 0 : index
    %c0_12 = arith.constant 0 : index
    %11 = vector.load %arg2[%c1_10, %c0_11, %c0_12] : memref<3x72x128xbf16, #tpu.memory_space<vmem>>, vector<1x72x128xbf16>
    %12 = vector.shape_cast %11 : vector<1x72x128xbf16> to vector<72x128xbf16>
    %cst_13 = arith.constant dense<0.000000e+00> : vector<16x128xf32>
    %13 = tpu.matmul %3, %12, %cst_13 {dimension_numbers = #tpu.dot_dimension_numbers<[1], [0], [0], [1], [0, 0, 1, 1], [], []>} : vector<16x72xbf16>, vector<72x128xbf16>, vector<16x128xf32> -> vector<16x128xf32>
    %14 = arith.addf %10, %13 : vector<16x128xf32>
    %c2_14 = arith.constant 2 : index
    %c0_15 = arith.constant 0 : index
    %c0_16 = arith.constant 0 : index
    %15 = vector.load %arg2[%c2_14, %c0_15, %c0_16] : memref<3x72x128xbf16, #tpu.memory_space<vmem>>, vector<1x72x128xbf16>
    %16 = vector.shape_cast %15 : vector<1x72x128xbf16> to vector<72x128xbf16>
    %cst_17 = arith.constant dense<0.000000e+00> : vector<16x128xf32>
    %17 = tpu.matmul %5, %16, %cst_17 {dimension_numbers = #tpu.dot_dimension_numbers<[1], [0], [0], [1], [0, 0, 1, 1], [], []>} : vector<16x72xbf16>, vector<72x128xbf16>, vector<16x128xf32> -> vector<16x128xf32>
    %18 = arith.addf %14, %17 : vector<16x128xf32>
    %c0_18 = arith.constant 0 : index
    %c0_19 = arith.constant 0 : index
    %19 = vector.load %arg3[%c0_18, %c0_19] : memref<16x128xf32, #tpu.memory_space<vmem>>, vector<16x128xf32>
    tpu.vector_store %arg3[%c0_18, %c0_19], %18 {strides = array<i32>} : memref<16x128xf32, #tpu.memory_space<vmem>>, vector<16x128xf32>,
    %cst_20 = arith.constant dense<0.000000e+00> : vector<128xf32>
    %20 = vector.multi_reduction <add>, %18, %cst_20 [0] : vector<16x128xf32> to vector<128xf32>
    %21 = vector.shape_cast %20 : vector<128xf32> to vector<1x128xf32>
    %cst_21 = arith.constant 1.600000e+01 : f32
    %22 = vector.broadcast %cst_21 : f32 to vector<1x128xf32>
    %23 = arith.divf %21, %22 : vector<1x128xf32>
    %24 = vector.broadcast %23 : vector<1x128xf32> to vector<16x128xf32>
    %25 = arith.subf %18, %24 : vector<16x128xf32>
    %26 = vector.broadcast %23 : vector<1x128xf32> to vector<16x128xf32>
    %27 = arith.subf %18, %26 : vector<16x128xf32>
    %28 = arith.mulf %25, %27 : vector<16x128xf32>
    %cst_22 = arith.constant dense<0.000000e+00> : vector<128xf32>
    %29 = vector.multi_reduction <add>, %28, %cst_22 [0] : vector<16x128xf32> to vector<128xf32>
    %30 = vector.shape_cast %29 : vector<128xf32> to vector<1x128xf32>
    %31 = vector.shape_cast %23 : vector<1x128xf32> to vector<1x1x128xf32>
    %c0_23 = arith.constant 0 : index
    %c0_24 = arith.constant 0 : index
    %c0_25 = arith.constant 0 : index
    %32 = vector.load %arg4[%c0_23, %c0_24, %c0_25] : memref<1x2x128xf32, #tpu.memory_space<vmem>>, vector<1x1x128xf32>
    tpu.vector_store %arg4[%c0_23, %c0_24, %c0_25], %31 {strides = array<i32>} : memref<1x2x128xf32, #tpu.memory_space<vmem>>, vector<1x1x128xf32>,
    %33 = vector.shape_cast %30 : vector<1x128xf32> to vector<1x1x128xf32>
    %c0_26 = arith.constant 0 : index
    %c1_27 = arith.constant 1 : index
    %c0_28 = arith.constant 0 : index
    %34 = vector.load %arg4[%c0_26, %c1_27, %c0_28] : memref<1x2x128xf32, #tpu.memory_space<vmem>>, vector<1x1x128xf32>
    tpu.vector_store %arg4[%c0_26, %c1_27, %c0_28], %33 {strides = array<i32>} : memref<1x2x128xf32, #tpu.memory_space<vmem>>, vector<1x1x128xf32>,
    return
  }
  func.func @transform_0(%arg0: i32) -> (i32, i32, i32) {
    %c0_i32 = arith.constant 0 : i32
    %c0_i32_0 = arith.constant 0 : i32
    %c0_i32_1 = arith.constant 0 : i32
    return %arg0, %c0_i32, %c0_i32_0 : i32, i32, i32
  }
  func.func @transform_1(%arg0: i32) -> (i32, i32, i32) {
    %c0_i32 = arith.constant 0 : i32
    %c0_i32_0 = arith.constant 0 : i32
    %c0_i32_1 = arith.constant 0 : i32
    %c0_i32_2 = arith.constant 0 : i32
    return %c0_i32, %c0_i32_0, %c0_i32_1 : i32, i32, i32
  }
  func.func @transform_2(%arg0: i32) -> (i32, i32) {
    %c0_i32 = arith.constant 0 : i32
    %c0_i32_0 = arith.constant 0 : i32
    return %arg0, %c0_i32 : i32, i32
  }
  func.func @transform_3(%arg0: i32) -> (i32, i32, i32) {
    %c0_i32 = arith.constant 0 : i32
    %c0_i32_0 = arith.constant 0 : i32
    %c0_i32_1 = arith.constant 0 : i32
    return %arg0, %c0_i32, %c0_i32_0 : i32, i32, i32
  }
}

</mosaic_0001>

<bundles_post_ra>
// kernel: tpu_custom_call.1
= control target key start
LH: loop header
LB: loop body
LE: loop exit
PB: predicated region body
PF: predicated region fallthrough
CT: control target
= control target key end

     0   :  { %9 = vsyncpa [#allocation3], 0  ;;  %s1191_s0 = inlined_call_operand.vmem [shape: bf16[2,18,72], index: 0, kind: input, shape index: {}]   ;;  %s1192_s1 = inlined_call_operand.hbm [shape: bf16[3,72,128], index: 1, kind: input, shape index: {}]   ;;  %s1193_s2 = inlined_call_operand.hbm [shape: f32[32,128], index: 2, kind: output, shape index: {0}]   ;;  %s1194_s3 = inlined_call_operand.hbm [shape: f32[2,2,128], index: 3, kind: output, shape index: {1}]  }
   0x1   :  { %10 = vsyncpa [#allocation4], 0 }
   0x2   :  { %12 = vsyncpa [#allocation4 + $0x1], 0 }
   0x3   :  { %13 = vsyncpa [#allocation7], 0 }
   0x4   :  { %15 = vsyncpa [#allocation7 + $0x1], 0  ;;  %s986_s12 = smov 0   ;;  %s988_s13 = smov 0  }
   0x5   :  { %s990_s14 = smov 0   ;;  %s992_s15 = smov 0  }
   0x6 LB: > { %s1007_s16 = sadd.s32 4294967295, %s955_s15   ;;  %s645_s17 = sadd.s32 4294967294, %s955_s15   ;;  %s955_s15 = sphi %s992_s15, %s1210_s15   ;;  %s951_s14 = sphi %s990_s14, %s1209_s14   ;;  %s947_s13 = sphi %s988_s13, %s1208_s13   ;;  %s943_s12 = sphi %s986_s12, %s1207_s12  }
   0x7   : > { %s1011_s18 = sadd.s32 1, %s955_s15   ;;  %s75_s19 = sadd.s32 1, %s951_s14 }
   0x8   : > { %s72_s20 = ssub.s32 %s955_s15, %s1011_s18  ;;  %p85_p0 = scmp.ne.s32.totalorder %s951_s14, %s947_s13 }
   0x9   : > { %p73_p1 = scmp.eq.s32.totalorder %s72_s20, 0  ;;  %p86_p2 = scmp.eq.s32.totalorder %s1007_s16, 1 }
   0xa   : > { %p91_p3 = scmp.ne.s32.totalorder %s947_s13, %s943_s12  ;;  %p92_p4 = scmp.eq.s32.totalorder %s645_s17, 1 }
   0xb   : > { %s1022_s21 = scalar_select %p73_p1, %s951_s14, %s75_s19  }
   0xc   : > { %p1024_p5 = por %p86_p2, %p85_p0  ;;  %p1028_p6 = por %p92_p4, %p91_p3 }
   0xd   : > { %p646_p7 = scmp.ge.s32.totalorder %s955_s15, 1  ;;  %p125_p8 = scmp.lt.s32.totalorder %s955_s15, 3 }
   0xe   : > { %s1198_s22 = scalar_select %p1024_p5, 1, 0 }
   0xf   : > { %s1199_s23 = scalar_select %p1028_p6, 1, 0 }
  0x10   : > { %p1195_p9 = scmp.eq.s32.totalorder %s1007_s16, 0  ;;  %p1035_p10 = pnand %p646_p7, %p125_p8 }
  0x11   : > { %s957_s25 = smov [#allocation2]   ;;  %s829_s30 = scalar_lea.hbm %s1192_s1, 1728 }
  0x12   : > { %s1200_s24 = scalar_select %p1035_p10, 1, 0 }
  0x13   : > { %s137_s26 = sshll.u32 %s957_s25, 4  ;;  %p758_p11 = pneg %p1035_p10  ;;  %s138_s26 = int_to_ptr.vmem [resolvable:$true] %s137_s26 }
  0x14   : > { %p830_p13 = scmp.ne.s32.totalorder %s1192_s1, %s829_s30  ;;  %p836_p3 = scmp.lt.u32.totalorder %s829_s30, %s1192_s1 }
  0x15   : > { %p1043_p12 = pnand %p1195_p9, %p758_p11 }
  0x17   : > { %p831_p0 = pneg %p1043_p12 }
  0x19   : > { %p832_p1 = pnand %p831_p0, %p830_p13 }
  0x1b   : > { %p833_p2 = pneg %p832_p1 }
  0x1d   : > { %p838_p4 = pnand %p836_p3, %p833_p2 }
  0x1f   : > { %841 = shalt.err (!%p838_p4)
}
  0x20   : > { %s842_s8 = scalar_lea.vmem %s138_s26, 1728  ;;  %p850_p9 = scmp.lt.s32.totalorder %s138_s26, %s138_s26 }
  0x21   : > { %p843_p7 = scmp.ne.s32.totalorder %s138_s26, %s842_s8  ;;  %p851_p6 = scmp.lt.s32.totalorder %s842_s8, %s842_s8 }
  0x23   : > { %p845_p8 = pnand %p843_p7, %p831_p0  ;;  %p852_p5 = por %p851_p6, %p850_p9 }
  0x25   : > { %p846_p11 = pneg %p845_p8 }
  0x27   : > { %p853_p10 = pnand %p852_p5, %p846_p11 }
  0x29   : > { %856 = shalt.err (!%p853_p10)
}
  0x2a   : > { %s958_s9 = smov 64   ;;  %s959_s10 = smov 4  }
  0x2b   : > { %761 = dma.hbm_to_vmem [thread:$0]  (!%p1043_p12), %s1192_s1, 1728, %s138_s26, [#allocation3], %s958_s9, %s958_s9, %s959_s10  }
  0x2c   : > { %p1202_p13 = scmp.ne.s32.totalorder %s1200_s24, 0 }
  0x2d   : > { %p1203_p1 = scmp.eq.s32.totalorder (!%p1202_p13), %s1007_s16, 0 }
  0x2e   : > { %161 = sbr.rel (%p1202_p13) target bundleno = 371 (0x173), region = 28 }
  0x35   : > { %930 = dma.done.wait (%p1203_p1), [#allocation3], 1728   ;;  %p1204_p0 = pmov %p1203_p1 }
  0x36   : > { %p190_p5 = scmp.lt.s32.totalorder %s1007_s16, 1  ;;  %v960_v0 = vmov 0.0   ;;  %vm961_vm0 = vmmov 0   ;;  %v811_v1 = vld [vmem:[#allocation2] sm:$0xff]   ;;  %v812_v2 = vld [vmem:[#allocation2 + $0x8] sm:$0xff]   ;;  %v813_v4 = vld [vmem:[#allocation2 + $0x10] sm:$0xff]  }
  0x37   : > { %932 = vsyncadd (%p1204_p0), [#allocation3], 4294965568  ;;  %715 = vmatprep.subr.bf16.mxu0 %v960_v0  ;;  %701 = vmatprep.subr.bf16.mxu1 %v960_v0  ;;  %v816_v3 = vld [vmem:[#allocation2 + $0x24] sm:$0xff]   ;;  %v820_v7 = vld [vmem:[#allocation2 + $0x2c] sm:$0xff]   ;;  %vm272_vm1 = vcmask 1043456   ;;  %vm268_vm2 = vcmask 588800  }
  0x38   : > { %725 = vmatprep.mubr.msk.bf16.mxu0 %vm961_vm0, %v960_v0  ;;  %s191_s19 = scalar_select %p190_p5, %s1007_s16, 1  ;;  %711 = vmatprep.mubr.msk.bf16.mxu1 %vm961_vm0, %v960_v0  ;;  %v814_v8 = vld [vmem:[#allocation2 + $0x18] sm:$0xff]   ;;  %v815_v10 = vld [vmem:[#allocation2 + $0x20] ss:$0 sps:$4 sm:$0xff]   ;;  %v826_v18 = vld [vmem:[#allocation2 + $0x44] ss:$0 sps:$4 sm:$0xff]  }
  0x39   : > { %716 = vmatpush3.bf16.msra.mxu0 %v811_v1  ;;  %702 = vmatpush3.bf16.msra.mxu1 %v816_v3  ;;  %v822_v11 = vld [vmem:[#allocation2 + $0x34] sm:$0xff]   ;;  %v347_v13 = vsel %vm272_vm1, %v815_v10, 0  ;;  %v824_v14 = vld [vmem:[#allocation2 + $0x3c] sm:$0xff]   ;;  %v819_v20 = vld [vmem:[#allocation2 + $0x48] sm:$0xff]   ;;  %v274_v23 = vsel %vm272_vm1, %v826_v18, 0  ;;  %vm403_vm4 = vcmask 1046528  }
  0x3a   : > { %s749_s20 = smul.u32 12, %s191_s19  ;;  %717 = vmatprep.subr.bf16.mxu0 %v960_v0  ;;  %703 = vmatprep.subr.bf16.mxu1 %v960_v0  ;;  %vm228_vm3 = vsmask.f32 7424  ;;  %v821_v24 = vld [vmem:[#allocation2 + $0x50] sm:$0xff]   ;;  %v823_v26 = vld [vmem:[#allocation2 + $0x58] sm:$0xff]   ;;  %v825_v29 = vld [vmem:[#allocation2 + $0x60] sm:$0xff]  }
  0x3b   : > { %v828_v30 = vld [vmem:[#allocation2 + $0x68] ss:$0 sps:$4 sm:$0xff]   ;;  %s1108_s27 = sand.u32 1, %s947_s13   ;;  %s682_s4 = sshll.u32 %s1007_s16, 8 }
  0x3c   : > { %s1081_s26 = scalar_lea.vmem %s1191_s0, %s749_s20  ;;  %v438_v33 = vsel %vm272_vm1, %v828_v30, 0  ;;  %s651_s28 = sshll.u32 %s1108_s27, 4 }
  0x3d   : > { %718 = vmatpush3.bf16.msra.mxu0 %v812_v2  ;;  %v197_v5 = vld [vmem:[%s1081_s26] sm:$0xf]  ;;  %v198_v6 = vld [vmem:[%s1081_s26 + $0x4] sm:$0xf]  ;;  %704 = vmatpush3.bf16.msra.mxu1 %v820_v7  ;;  %s182_s29 = scalar_lea.vmem [#allocation5], %s651_s28  ;;  %s1117_s7 = scalar_lea.hbm %s1193_s2, %s682_s4 }
  0x3e   : > { %719 = vmatprep.subr.bf16.mxu0 %v960_v0  ;;  %v654_v9 = vcombine.low %v197_v5, %v198_v6  ;;  %705 = vmatprep.subr.bf16.mxu1 %v960_v0  ;;  %v827_v15 = vld [vmem:[%s1081_s26 + $0x8] ss:$0 sps:$4 sm:$0x11]   ;;  %v200_v27 = vld [vmem:[%s1081_s26] sm:$0xe]  ;;  %s526_s30 = sshll.u32 %s182_s29, 4  ;;  %s1112_s30 = int_to_ptr.vmem [resolvable:$true] %s526_s30 }
  0x3f   : > { %v237_v19 = vshll.u32 %v827_v15, 16  ;;  %v668_v28 = vcombine.low %v200_v27, %v198_v6  ;;  %v405_v32 = vrot.slane %v827_v15, 1  ;;  %s508_s8 = scalar_lea.sflag [#allocation4], %s1108_s27  ;;  %s857_s9 = scalar_lea.vmem %s1112_s30, 256 }
  0x40   : > { %v232_v12 = vshll.u32 %v654_v9, 16  ;;  %v230_v16 = vshrl.u32 %v654_v9, 16  ;;  %p858_p6 = scmp.ne.s32.totalorder %s1112_s30, %s857_s9  ;;  %p1205_p9 = scmp.ne.s32.totalorder %s1198_s22, 0 }
  0x41   : > { %720 = vmatpush3.bf16.msra.mxu0 %v813_v4  ;;  %706 = vmatpush3.bf16.msra.mxu1 %v822_v11  ;;  %v239_v22 = vrot.slane %v237_v19, 1  ;;  %v404_v31 = vrot.slane %v668_v28, 1  ;;  %s962_s10 = smov [#allocation5]  }
  0x42   : > { %721 = vmatprep.subr.bf16.mxu0 %v960_v0  ;;  %v234_v17 = vrot.slane %v232_v12, 1  ;;  %707 = vmatprep.subr.bf16.mxu1 %v960_v0  ;;  %p859_p10 = pnand %p858_p6, %p1205_p9  ;;  %s861_s11 = sshll.u32 %s962_s10, 4  ;;  %s862_s11 = int_to_ptr.vmem [resolvable:$false] %s861_s11 }
  0x43   : > { %v406_v34 = vsel %vm403_vm4, %v404_v31, %v405_v32  ;;  %s863_s17 = scalar_lea.vmem %s862_s11, 512  ;;  %p864_p2 = scmp.lt.s32.totalorder %s1112_s30, %s862_s11 }
  0x44   : > { %v235_v21 = vor.u32 %v234_v17, %v230_v16  ;;  %p860_p12 = pneg %p859_p10  ;;  %p865_p3 = scmp.lt.s32.totalorder %s863_s17, %s857_s9 }
  0x45   : > { %722 = vmatpush3.bf16.msra.mxu0 %v814_v8  ;;  %708 = vmatpush3.bf16.msra.mxu1 %v824_v14 }
  0x46   : > { %723 = vmatprep.subr.bf16.mxu0 %v960_v0  ;;  %709 = vmatprep.subr.bf16.mxu1 %v960_v0  ;;  %v240_v25 = vsel %vm228_vm3, %v235_v21, %v239_v22  ;;  %p866_p4 = por %p865_p3, %p864_p2 }
  0x48   : > { %p867_p7 = pnand %p866_p4, %p860_p12 }
  0x49   : > { %724 = vmatpush3.bf16.msra.mxu0 %v347_v13  ;;  %710 = vmatpush3.bf16.msra.mxu1 %v274_v23 }
  0x4a   : > { %729 = vmatprep.subr.bf16.mxu0 %v960_v0 }
  0x4c   : > { %726 = vmatmul.mubr.msk.bf16.vlgmr.msra.gmra.mrb[0].mxu0 %vm268_vm2, %v654_v9  ;;  %712 = vmatmul.mubr.msk.bf16.vlgmr.msra.gmra.mrb[0].mxu1 %vm268_vm2, %v240_v25 }
  0x4d   : > { %730 = vmatpush3.bf16.msra.mxu0 %v819_v20  ;;  %739 = vmatprep.mubr.msk.bf16.mxu0 %vm961_vm0, %v960_v0 }
  0x4e   : > { %731 = vmatprep.subr.bf16.mxu0 %v960_v0 }
  0x51   : > { %732 = vmatpush3.bf16.msra.mxu0 %v821_v24 }
  0x52   : > { %733 = vmatprep.subr.bf16.mxu0 %v960_v0 }
  0x55   : > { %734 = vmatpush3.bf16.msra.mxu0 %v823_v26 }
  0x56   : > { %735 = vmatprep.subr.bf16.mxu0 %v960_v0 }
  0x59   : > { %736 = vmatpush3.bf16.msra.mxu0 %v825_v29 }
  0x5a   : > { %737 = vmatprep.subr.bf16.mxu0 %v960_v0 }
  0x5d   : > { %738 = vmatpush3.bf16.msra.mxu0 %v438_v33 }
  0x60   : > { %740 = vmatmul.mubr.msk.bf16.vlgmr.msra.gmra.mrb[0].mxu0 %vm268_vm2, %v406_v34 }
 0x11f   : > { %v310_v35 = vpop.f32.mrb[0].mxu1 }
 0x120   : > { %v713_v36 = vpop.f32.mrb[1].mxu1 }
 0x121   : > { %v313_v37 = vpop.f32.mrb[2].mxu1 }
 0x122   : > { %v714_v38 = vpop.f32.mrb[3].mxu1 }
 0x133   : > { %v474_v39 = vpop.f32.mrb[0].mxu0 }
 0x134   : > { %v743_v40 = vadd.f32 %v474_v39, %v310_v35  ;;  %v741_v41 = vpop.f32.mrb[1].mxu0 }
 0x135   : > { %v477_v42 = vpop.f32.mrb[2].mxu0 }
 0x136   : > { %483 = vst [vmem:[%s182_s29] sm:$0xff] %v743_v40  ;;  %v744_v43 = vadd.f32 %v477_v42, %v313_v37  ;;  %v742_v44 = vpop.f32.mrb[3].mxu0 }
 0x138   : > { %484 = vst [vmem:[%s182_s29 + $0x8] sm:$0xff] %v744_v43  ;;  %v485_v45 = vadd.f32 %v744_v43, %v743_v40 }
 0x139   : > { %870 = shalt.err (!%p867_p7)
}
 0x13a   : > { %s871_s19 = scalar_lea.hbm %s1117_s7, 256  ;;  %s875_s25 = scalar_lea.hbm %s1193_s2, 512 }
 0x13b   : > { %p872_p8 = scmp.ne.s32.totalorder %s1117_s7, %s871_s19  ;;  %p876_p1 = scmp.lt.u32.totalorder %s1117_s7, %s1193_s2 }
 0x13c   : > { %p877_p0 = scmp.lt.u32.totalorder %s875_s25, %s871_s19  ;;  %p879_p6 = scmp.lt.u32.totalorder %s871_s19, %s1117_s7 }
 0x13d   : > { %p873_p11 = pnand %p872_p8, %p1205_p9 }
 0x13e   : > { %p878_p5 = por %p877_p0, %p876_p1 }
 0x13f   : > { %p874_p13 = pneg %p873_p11 }
 0x140   : > { %p880_p10 = por %p879_p6, %p878_p5 }
 0x142   : > { %p881_p12 = pnand %p880_p10, %p874_p13 }
 0x144   : > { %884 = shalt.err (!%p881_p12)
}
 0x145   : > { %s963_s29 = smov 128   ;;  %s964_s4 = smov 8   ;;  %v486_v46 = vrot.slane %v485_v45, 4 }
 0x146   : > { %754 = dma.vmem_to_hbm [thread:$0]  (%p1205_p9), %s1112_s30, 256, %s1117_s7, %s508_s8, %s963_s29, %s963_s29, %s964_s4  }
 0x147   : > { %v487_v47 = vadd.f32 %v486_v46, %v485_v45  ;;  %s652_s5 = sshll.u32 %s1108_s27, 1  ;;  %s679_s30 = sshll.u32 %s1007_s16, 5 }
 0x148   : > { %s189_s6 = scalar_lea.vmem [#allocation6], %s652_s5  ;;  %s1148_s10 = scalar_lea.hbm %s1194_s3, %s679_s30 }
 0x149   : > { %v488_v48 = vrot.slane %v487_v47, 2  ;;  %s542_s7 = sshll.u32 %s189_s6, 4  ;;  %s513_s11 = scalar_lea.sflag [#allocation7], %s1108_s27  ;;  %s1150_s7 = int_to_ptr.vmem [resolvable:$true] %s542_s7 }
 0x14a   : > { %s885_s17 = scalar_lea.vmem %s1150_s7, 32  ;;  %s965_s16 = smov [#allocation6]  }
 0x14b   : > { %v489_v49 = vadd.f32 %v488_v48, %v487_v47  ;;  %p886_p2 = scmp.ne.s32.totalorder %s1150_s7, %s885_s17  ;;  %s889_s19 = sshll.u32 %s965_s16, 4  ;;  %s890_s19 = int_to_ptr.vmem [resolvable:$false] %s889_s19 }
 0x14c   : > { %s891_s20 = scalar_lea.vmem %s890_s19, 64  ;;  %p892_p7 = scmp.lt.s32.totalorder %s1150_s7, %s890_s19 }
 0x14d   : > { %v490_v50 = vrot.slane %v489_v49, 1  ;;  %p887_p3 = pnand %p886_p2, %p1205_p9  ;;  %p893_p8 = scmp.lt.s32.totalorder %s891_s20, %s885_s17 }
 0x14f   : > { %v491_v51 = vadd.f32 %v490_v50, %v489_v49  ;;  %p888_p4 = pneg %p887_p3  ;;  %p894_p11 = por %p893_p8, %p892_p7 }
 0x151   : > { %v493_v52 = vmul.f32 0.0625, %v491_v51  ;;  %p895_p13 = pnand %p894_p11, %p888_p4 }
 0x153   : > { %v494_v53 = vsub.f32 %v743_v40, %v493_v52  ;;  %v495_v54 = vsub.f32 %v744_v43, %v493_v52  ;;  %505 = vst [vmem:[%s189_s6] sm:$0x1] %v493_v52 }
 0x155   : > { %v496_v55 = vmul.f32 %v494_v53, %v494_v53  ;;  %v497_v56 = vmul.f32 %v495_v54, %v495_v54 }
 0x157   : > { %v498_v57 = vadd.f32 %v497_v56, %v496_v55 }
 0x159   : > { %v499_v58 = vrot.slane %v498_v57, 4 }
 0x15b   : > { %v500_v59 = vadd.f32 %v499_v58, %v498_v57 }
 0x15d   : > { %v501_v60 = vrot.slane %v500_v59, 2 }
 0x15f   : > { %v502_v61 = vadd.f32 %v501_v60, %v500_v59 }
 0x161   : > { %v503_v62 = vrot.slane %v502_v61, 1 }
 0x163   : > { %v504_v63 = vadd.f32 %v503_v62, %v502_v61 }
 0x165   : > { %506 = vst [vmem:[%s189_s6 + $0x1] sm:$0x1] %v504_v63 }
 0x166   : > { %898 = shalt.err (!%p895_p13)
}
 0x167   : > { %s899_s27 = scalar_lea.hbm %s1148_s10, 32  ;;  %s903_s26 = scalar_lea.hbm %s1194_s3, 64 }
 0x168   : > { %p900_p1 = scmp.ne.s32.totalorder %s1148_s10, %s899_s27  ;;  %p904_p6 = scmp.lt.u32.totalorder %s1148_s10, %s1194_s3 }
 0x169   : > { %p905_p10 = scmp.lt.u32.totalorder %s903_s26, %s899_s27  ;;  %p907_p2 = scmp.lt.u32.totalorder %s899_s27, %s1148_s10 }
 0x16a   : > { %p901_p0 = pnand %p900_p1, %p1205_p9 }
 0x16b   : > { %p906_p12 = por %p905_p10, %p904_p6 }
 0x16c   : > { %p902_p5 = pneg %p901_p0 }
 0x16d   : > { %p908_p3 = por %p907_p2, %p906_p12 }
 0x16f   : > { %p909_p4 = pnand %p908_p3, %p902_p5 }
 0x171   : > { %912 = shalt.err (!%p909_p4)
}
 0x172   : > { %755 = dma.vmem_to_hbm [thread:$0]  (%p1205_p9), %s1150_s7, 32, %s1148_s10, %s513_s11  }
 0x173 PF: > { %p771_p7 = scmp.ge.s32.totalorder %s955_s15, 2  ;;  %s554_s4 = sand.u32 1, %s943_s12  }
 0x174   : > { %p1206_p8 = scmp.ne.s32.totalorder %s1199_s23, 0  ;;  %s555_s5 = scalar_lea.sflag [#allocation4], %s554_s4 }
 0x176   : > { %p763_p11 = pnand %p771_p7, %p1206_p8 }
 0x178   : > { %934 = dma.done.wait (!%p763_p11), %s555_s5, 256  }
 0x179   : > { %936 = vsyncadd (!%p763_p11), %s555_s5, 4294967040  ;;  %s564_s6 = scalar_lea.sflag [#allocation7], %s554_s4 }
 0x17a   : > { %938 = dma.done.wait (!%p763_p11), %s564_s6, 32  }
 0x17b   : > { %940 = vsyncadd (!%p763_p11), %s564_s6, 4294967264  ;;  %p18_p9 = scmp.ge.s32.totalorder %s1011_s18, 4   ;;  %s1207_s12 = smov %s947_s13 }
 0x17c   : > { %s1208_s13 = smov %s951_s14  ;;  %s1209_s14 = smov %s1022_s21 }
 0x17d   : > { %s1210_s15 = smov %s1011_s18  ;;  %20 = sbr.rel (!%p18_p9) target bundleno = 6 (0x6), region = 87 }
 0x184   :  { %569 = vsyncpa [#allocation3], 1 }
 0x185   :  { %571 = vsyncpa [#allocation3 + $0x1], 1 }
 0x186   :  { %572 = vsyncpa [#allocation4], 1 }
 0x187   :  { %574 = vsyncpa [#allocation4 + $0x1], 1 }
 0x188   :  { %575 = vsyncpa [#allocation7], 1 }
 0x189   :  { %577 = vsyncpa [#allocation7 + $0x1], 1 }

// kernel: tpu_custom_call.1
= control target key start
LH: loop header
LB: loop body
LE: loop exit
PB: predicated region body
PF: predicated region fallthrough
CT: control target
= control target key end

     0   :  { %9 = vsyncpa [#allocation3], 0  ;;  %s1191_s0 = inlined_call_operand.vmem [shape: bf16[2,18,72], index: 0, kind: input, shape index: {}]   ;;  %s1192_s1 = inlined_call_operand.hbm [shape: bf16[3,72,128], index: 1, kind: input, shape index: {}]   ;;  %s1193_s2 = inlined_call_operand.hbm [shape: f32[32,128], index: 2, kind: output, shape index: {0}]   ;;  %s1194_s3 = inlined_call_operand.hbm [shape: f32[2,2,128], index: 3, kind: output, shape index: {1}]  }
   0x1   :  { %10 = vsyncpa [#allocation4], 0 }
   0x2   :  { %12 = vsyncpa [#allocation4 + $0x1], 0 }
   0x3   :  { %13 = vsyncpa [#allocation7], 0 }
   0x4   :  { %15 = vsyncpa [#allocation7 + $0x1], 0  ;;  %s986_s12 = smov 0   ;;  %s988_s13 = smov 0  }
   0x5   :  { %s990_s14 = smov 0   ;;  %s992_s15 = smov 0  }
   0x6 LB: > { %s1007_s16 = sadd.s32 4294967295, %s955_s15   ;;  %s645_s17 = sadd.s32 4294967294, %s955_s15   ;;  %s955_s15 = sphi %s992_s15, %s1210_s15   ;;  %s951_s14 = sphi %s990_s14, %s1209_s14   ;;  %s947_s13 = sphi %s988_s13, %s1208_s13   ;;  %s943_s12 = sphi %s986_s12, %s1207_s12  }
   0x7   : > { %s1011_s18 = sadd.s32 1, %s955_s15   ;;  %s75_s19 = sadd.s32 1, %s951_s14 }
   0x8   : > { %s72_s20 = ssub.s32 %s955_s15, %s1011_s18  ;;  %p85_p0 = scmp.ne.s32.totalorder %s951_s14, %s947_s13 }
   0x9   : > { %p73_p1 = scmp.eq.s32.totalorder %s72_s20, 0  ;;  %p86_p2 = scmp.eq.s32.totalorder %s1007_s16, 1 }
   0xa   : > { %p91_p3 = scmp.ne.s32.totalorder %s947_s13, %s943_s12  ;;  %p92_p4 = scmp.eq.s32.totalorder %s645_s17, 1 }
   0xb   : > { %s1022_s21 = scalar_select %p73_p1, %s951_s14, %s75_s19  }
   0xc   : > { %p1024_p5 = por %p86_p2, %p85_p0  ;;  %p1028_p6 = por %p92_p4, %p91_p3 }
   0xd   : > { %p646_p7 = scmp.ge.s32.totalorder %s955_s15, 1  ;;  %p125_p8 = scmp.lt.s32.totalorder %s955_s15, 3 }
   0xe   : > { %s1198_s22 = scalar_select %p1024_p5, 1, 0 }
   0xf   : > { %s1199_s23 = scalar_select %p1028_p6, 1, 0 }
  0x10   : > { %p1195_p9 = scmp.eq.s32.totalorder %s1007_s16, 0  ;;  %p1035_p10 = pnand %p646_p7, %p125_p8 }
  0x11   : > { %s957_s25 = smov [#allocation2]   ;;  %s829_s30 = scalar_lea.hbm %s1192_s1, 1728 }
  0x12   : > { %s1200_s24 = scalar_select %p1035_p10, 1, 0 }
  0x13   : > { %s137_s26 = sshll.u32 %s957_s25, 4  ;;  %p758_p11 = pneg %p1035_p10  ;;  %s138_s26 = int_to_ptr.vmem [resolvable:$true] %s137_s26 }
  0x14   : > { %p830_p13 = scmp.ne.s32.totalorder %s1192_s1, %s829_s30  ;;  %p836_p3 = scmp.lt.u32.totalorder %s829_s30, %s1192_s1 }
  0x15   : > { %p1043_p12 = pnand %p1195_p9, %p758_p11 }
  0x17   : > { %p831_p0 = pneg %p1043_p12 }
  0x19   : > { %p832_p1 = pnand %p831_p0, %p830_p13 }
  0x1b   : > { %p833_p2 = pneg %p832_p1 }
  0x1d   : > { %p838_p4 = pnand %p836_p3, %p833_p2 }
  0x1f   : > { %841 = shalt.err (!%p838_p4)
}
  0x20   : > { %s842_s8 = scalar_lea.vmem %s138_s26, 1728  ;;  %p850_p9 = scmp.lt.s32.totalorder %s138_s26, %s138_s26 }
  0x21   : > { %p843_p7 = scmp.ne.s32.totalorder %s138_s26, %s842_s8  ;;  %p851_p6 = scmp.lt.s32.totalorder %s842_s8, %s842_s8 }
  0x23   : > { %p845_p8 = pnand %p843_p7, %p831_p0  ;;  %p852_p5 = por %p851_p6, %p850_p9 }
  0x25   : > { %p846_p11 = pneg %p845_p8 }
  0x27   : > { %p853_p10 = pnand %p852_p5, %p846_p11 }
  0x29   : > { %856 = shalt.err (!%p853_p10)
}
  0x2a   : > { %s958_s9 = smov 64   ;;  %s959_s10 = smov 4  }
  0x2b   : > { %761 = dma.hbm_to_vmem [thread:$0]  (!%p1043_p12), %s1192_s1, 1728, %s138_s26, [#allocation3], %s958_s9, %s958_s9, %s959_s10  }
  0x2c   : > { %p1202_p13 = scmp.ne.s32.totalorder %s1200_s24, 0 }
  0x2d   : > { %p1203_p1 = scmp.eq.s32.totalorder (!%p1202_p13), %s1007_s16, 0 }
  0x2e   : > { %161 = sbr.rel (%p1202_p13) target bundleno = 371 (0x173), region = 28 }
  0x35   : > { %930 = dma.done.wait (%p1203_p1), [#allocation3], 1728   ;;  %p1204_p0 = pmov %p1203_p1 }
  0x36   : > { %p190_p5 = scmp.lt.s32.totalorder %s1007_s16, 1  ;;  %v960_v0 = vmov 0.0   ;;  %vm961_vm0 = vmmov 0   ;;  %v811_v1 = vld [vmem:[#allocation2] sm:$0xff]   ;;  %v812_v2 = vld [vmem:[#allocation2 + $0x8] sm:$0xff]   ;;  %v813_v4 = vld [vmem:[#allocation2 + $0x10] sm:$0xff]  }
  0x37   : > { %932 = vsyncadd (%p1204_p0), [#allocation3], 4294965568  ;;  %715 = vmatprep.subr.bf16.mxu0 %v960_v0  ;;  %701 = vmatprep.subr.bf16.mxu1 %v960_v0  ;;  %v816_v3 = vld [vmem:[#allocation2 + $0x24] sm:$0xff]   ;;  %v820_v7 = vld [vmem:[#allocation2 + $0x2c] sm:$0xff]   ;;  %vm272_vm1 = vcmask 1043456   ;;  %vm268_vm2 = vcmask 588800  }
  0x38   : > { %725 = vmatprep.mubr.msk.bf16.mxu0 %vm961_vm0, %v960_v0  ;;  %s191_s19 = scalar_select %p190_p5, %s1007_s16, 1  ;;  %711 = vmatprep.mubr.msk.bf16.mxu1 %vm961_vm0, %v960_v0  ;;  %v814_v8 = vld [vmem:[#allocation2 + $0x18] sm:$0xff]   ;;  %v815_v10 = vld [vmem:[#allocation2 + $0x20] ss:$0 sps:$4 sm:$0xff]   ;;  %v826_v18 = vld [vmem:[#allocation2 + $0x44] ss:$0 sps:$4 sm:$0xff]  }
  0x39   : > { %716 = vmatpush3.bf16.msra.mxu0 %v811_v1  ;;  %702 = vmatpush3.bf16.msra.mxu1 %v816_v3  ;;  %v822_v11 = vld [vmem:[#allocation2 + $0x34] sm:$0xff]   ;;  %v347_v13 = vsel %vm272_vm1, %v815_v10, 0  ;;  %v824_v14 = vld [vmem:[#allocation2 + $0x3c] sm:$0xff]   ;;  %v819_v20 = vld [vmem:[#allocation2 + $0x48] sm:$0xff]   ;;  %v274_v23 = vsel %vm272_vm1, %v826_v18, 0  ;;  %vm403_vm4 = vcmask 1046528  }
  0x3a   : > { %s749_s20 = smul.u32 12, %s191_s19  ;;  %717 = vmatprep.subr.bf16.mxu0 %v960_v0  ;;  %703 = vmatprep.subr.bf16.mxu1 %v960_v0  ;;  %vm228_vm3 = vsmask.f32 7424  ;;  %v821_v24 = vld [vmem:[#allocation2 + $0x50] sm:$0xff]   ;;  %v823_v26 = vld [vmem:[#allocation2 + $0x58] sm:$0xff]   ;;  %v825_v29 = vld [vmem:[#allocation2 + $0x60] sm:$0xff]  }
  0x3b   : > { %v828_v30 = vld [vmem:[#allocation2 + $0x68] ss:$0 sps:$4 sm:$0xff]   ;;  %s1108_s27 = sand.u32 1, %s947_s13   ;;  %s682_s4 = sshll.u32 %s1007_s16, 8 }
  0x3c   : > { %s1081_s26 = scalar_lea.vmem %s1191_s0, %s749_s20  ;;  %v438_v33 = vsel %vm272_vm1, %v828_v30, 0  ;;  %s651_s28 = sshll.u32 %s1108_s27, 4 }
  0x3d   : > { %718 = vmatpush3.bf16.msra.mxu0 %v812_v2  ;;  %v197_v5 = vld [vmem:[%s1081_s26] sm:$0xf]  ;;  %v198_v6 = vld [vmem:[%s1081_s26 + $0x4] sm:$0xf]  ;;  %704 = vmatpush3.bf16.msra.mxu1 %v820_v7  ;;  %s182_s29 = scalar_lea.vmem [#allocation5], %s651_s28  ;;  %s1117_s7 = scalar_lea.hbm %s1193_s2, %s682_s4 }
  0x3e   : > { %719 = vmatprep.subr.bf16.mxu0 %v960_v0  ;;  %v654_v9 = vcombine.low %v197_v5, %v198_v6  ;;  %705 = vmatprep.subr.bf16.mxu1 %v960_v0  ;;  %v827_v15 = vld [vmem:[%s1081_s26 + $0x8] ss:$0 sps:$4 sm:$0x11]   ;;  %v200_v27 = vld [vmem:[%s1081_s26] sm:$0xe]  ;;  %s526_s30 = sshll.u32 %s182_s29, 4  ;;  %s1112_s30 = int_to_ptr.vmem [resolvable:$true] %s526_s30 }
  0x3f   : > { %v237_v19 = vshll.u32 %v827_v15, 16  ;;  %v668_v28 = vcombine.low %v200_v27, %v198_v6  ;;  %v405_v32 = vrot.slane %v827_v15, 1  ;;  %s508_s8 = scalar_lea.sflag [#allocation4], %s1108_s27  ;;  %s857_s9 = scalar_lea.vmem %s1112_s30, 256 }
  0x40   : > { %v232_v12 = vshll.u32 %v654_v9, 16  ;;  %v230_v16 = vshrl.u32 %v654_v9, 16  ;;  %p858_p6 = scmp.ne.s32.totalorder %s1112_s30, %s857_s9  ;;  %p1205_p9 = scmp.ne.s32.totalorder %s1198_s22, 0 }
  0x41   : > { %720 = vmatpush3.bf16.msra.mxu0 %v813_v4  ;;  %706 = vmatpush3.bf16.msra.mxu1 %v822_v11  ;;  %v239_v22 = vrot.slane %v237_v19, 1  ;;  %v404_v31 = vrot.slane %v668_v28, 1  ;;  %s962_s10 = smov [#allocation5]  }
  0x42   : > { %721 = vmatprep.subr.bf16.mxu0 %v960_v0  ;;  %v234_v17 = vrot.slane %v232_v12, 1  ;;  %707 = vmatprep.subr.bf16.mxu1 %v960_v0  ;;  %p859_p10 = pnand %p858_p6, %p1205_p9  ;;  %s861_s11 = sshll.u32 %s962_s10, 4  ;;  %s862_s11 = int_to_ptr.vmem [resolvable:$false] %s861_s11 }
  0x43   : > { %v406_v34 = vsel %vm403_vm4, %v404_v31, %v405_v32  ;;  %s863_s17 = scalar_lea.vmem %s862_s11, 512  ;;  %p864_p2 = scmp.lt.s32.totalorder %s1112_s30, %s862_s11 }
  0x44   : > { %v235_v21 = vor.u32 %v234_v17, %v230_v16  ;;  %p860_p12 = pneg %p859_p10  ;;  %p865_p3 = scmp.lt.s32.totalorder %s863_s17, %s857_s9 }
  0x45   : > { %722 = vmatpush3.bf16.msra.mxu0 %v814_v8  ;;  %708 = vmatpush3.bf16.msra.mxu1 %v824_v14 }
  0x46   : > { %723 = vmatprep.subr.bf16.mxu0 %v960_v0  ;;  %709 = vmatprep.subr.bf16.mxu1 %v960_v0  ;;  %v240_v25 = vsel %vm228_vm3, %v235_v21, %v239_v22  ;;  %p866_p4 = por %p865_p3, %p864_p2 }
  0x48   : > { %p867_p7 = pnand %p866_p4, %p860_p12 }
  0x49   : > { %724 = vmatpush3.bf16.msra.mxu0 %v347_v13  ;;  %710 = vmatpush3.bf16.msra.mxu1 %v274_v23 }
  0x4a   : > { %729 = vmatprep.subr.bf16.mxu0 %v960_v0 }
  0x4c   : > { %726 = vmatmul.mubr.msk.bf16.vlgmr.msra.gmra.mrb[0].mxu0 %vm268_vm2, %v654_v9  ;;  %712 = vmatmul.mubr.msk.bf16.vlgmr.msra.gmra.mrb[0].mxu1 %vm268_vm2, %v240_v25 }
  0x4d   : > { %730 = vmatpush3.bf16.msra.mxu0 %v819_v20  ;;  %739 = vmatprep.mubr.msk.bf16.mxu0 %vm961_vm0, %v960_v0 }
  0x4e   : > { %731 = vmatprep.subr.bf16.mxu0 %v960_v0 }
  0x51   : > { %732 = vmatpush3.bf16.msra.mxu0 %v821_v24 }
  0x52   : > { %733 = vmatprep.subr.bf16.mxu0 %v960_v0 }
  0x55   : > { %734 = vmatpush3.bf16.msra.mxu0 %v823_v26 }
  0x56   : > { %735 = vmatprep.subr.bf16.mxu0 %v960_v0 }
  0x59   : > { %736 = vmatpush3.bf16.msra.mxu0 %v825_v29 }
  0x5a   : > { %737 = vmatprep.subr.bf16.mxu0 %v960_v0 }
  0x5d   : > { %738 = vmatpush3.bf16.msra.mxu0 %v438_v33 }
  0x60   : > { %740 = vmatmul.mubr.msk.bf16.vlgmr.msra.gmra.mrb[0].mxu0 %vm268_vm2, %v406_v34 }
 0x11f   : > { %v310_v35 = vpop.f32.mrb[0].mxu1 }
 0x120   : > { %v713_v36 = vpop.f32.mrb[1].mxu1 }
 0x121   : > { %v313_v37 = vpop.f32.mrb[2].mxu1 }
 0x122   : > { %v714_v38 = vpop.f32.mrb[3].mxu1 }
 0x133   : > { %v474_v39 = vpop.f32.mrb[0].mxu0 }
 0x134   : > { %v743_v40 = vadd.f32 %v474_v39, %v310_v35  ;;  %v741_v41 = vpop.f32.mrb[1].mxu0 }
 0x135   : > { %v477_v42 = vpop.f32.mrb[2].mxu0 }
 0x136   : > { %483 = vst [vmem:[%s182_s29] sm:$0xff] %v743_v40  ;;  %v744_v43 = vadd.f32 %v477_v42, %v313_v37  ;;  %v742_v44 = vpop.f32.mrb[3].mxu0 }
 0x138   : > { %484 = vst [vmem:[%s182_s29 + $0x8] sm:$0xff] %v744_v43  ;;  %v485_v45 = vadd.f32 %v744_v43, %v743_v40 }
 0x139   : > { %870 = shalt.err (!%p867_p7)
}
 0x13a   : > { %s871_s19 = scalar_lea.hbm %s1117_s7, 256  ;;  %s875_s25 = scalar_lea.hbm %s1193_s2, 512 }
 0x13b   : > { %p872_p8 = scmp.ne.s32.totalorder %s1117_s7, %s871_s19  ;;  %p876_p1 = scmp.lt.u32.totalorder %s1117_s7, %s1193_s2 }
 0x13c   : > { %p877_p0 = scmp.lt.u32.totalorder %s875_s25, %s871_s19  ;;  %p879_p6 = scmp.lt.u32.totalorder %s871_s19, %s1117_s7 }
 0x13d   : > { %p873_p11 = pnand %p872_p8, %p1205_p9 }
 0x13e   : > { %p878_p5 = por %p877_p0, %p876_p1 }
 0x13f   : > { %p874_p13 = pneg %p873_p11 }
 0x140   : > { %p880_p10 = por %p879_p6, %p878_p5 }
 0x142   : > { %p881_p12 = pnand %p880_p10, %p874_p13 }
 0x144   : > { %884 = shalt.err (!%p881_p12)
}
 0x145   : > { %s963_s29 = smov 128   ;;  %s964_s4 = smov 8   ;;  %v486_v46 = vrot.slane %v485_v45, 4 }
 0x146   : > { %754 = dma.vmem_to_hbm [thread:$0]  (%p1205_p9), %s1112_s30, 256, %s1117_s7, %s508_s8, %s963_s29, %s963_s29, %s964_s4  }
 0x147   : > { %v487_v47 = vadd.f32 %v486_v46, %v485_v45  ;;  %s652_s5 = sshll.u32 %s1108_s27, 1  ;;  %s679_s30 = sshll.u32 %s1007_s16, 5 }
 0x148   : > { %s189_s6 = scalar_lea.vmem [#allocation6], %s652_s5  ;;  %s1148_s10 = scalar_lea.hbm %s1194_s3, %s679_s30 }
 0x149   : > { %v488_v48 = vrot.slane %v487_v47, 2  ;;  %s542_s7 = sshll.u32 %s189_s6, 4  ;;  %s513_s11 = scalar_lea.sflag [#allocation7], %s1108_s27  ;;  %s1150_s7 = int_to_ptr.vmem [resolvable:$true] %s542_s7 }
 0x14a   : > { %s885_s17 = scalar_lea.vmem %s1150_s7, 32  ;;  %s965_s16 = smov [#allocation6]  }
 0x14b   : > { %v489_v49 = vadd.f32 %v488_v48, %v487_v47  ;;  %p886_p2 = scmp.ne.s32.totalorder %s1150_s7, %s885_s17  ;;  %s889_s19 = sshll.u32 %s965_s16, 4  ;;  %s890_s19 = int_to_ptr.vmem [resolvable:$false] %s889_s19 }
 0x14c   : > { %s891_s20 = scalar_lea.vmem %s890_s19, 64  ;;  %p892_p7 = scmp.lt.s32.totalorder %s1150_s7, %s890_s19 }
 0x14d   : > { %v490_v50 = vrot.slane %v489_v49, 1  ;;  %p887_p3 = pnand %p886_p2, %p1205_p9  ;;  %p893_p8 = scmp.lt.s32.totalorder %s891_s20, %s885_s17 }
 0x14f   : > { %v491_v51 = vadd.f32 %v490_v50, %v489_v49  ;;  %p888_p4 = pneg %p887_p3  ;;  %p894_p11 = por %p893_p8, %p892_p7 }
 0x151   : > { %v493_v52 = vmul.f32 0.0625, %v491_v51  ;;  %p895_p13 = pnand %p894_p11, %p888_p4 }
 0x153   : > { %v494_v53 = vsub.f32 %v743_v40, %v493_v52  ;;  %v495_v54 = vsub.f32 %v744_v43, %v493_v52  ;;  %505 = vst [vmem:[%s189_s6] sm:$0x1] %v493_v52 }
 0x155   : > { %v496_v55 = vmul.f32 %v494_v53, %v494_v53  ;;  %v497_v56 = vmul.f32 %v495_v54, %v495_v54 }
 0x157   : > { %v498_v57 = vadd.f32 %v497_v56, %v496_v55 }
 0x159   : > { %v499_v58 = vrot.slane %v498_v57, 4 }
 0x15b   : > { %v500_v59 = vadd.f32 %v499_v58, %v498_v57 }
 0x15d   : > { %v501_v60 = vrot.slane %v500_v59, 2 }
 0x15f   : > { %v502_v61 = vadd.f32 %v501_v60, %v500_v59 }
 0x161   : > { %v503_v62 = vrot.slane %v502_v61, 1 }
 0x163   : > { %v504_v63 = vadd.f32 %v503_v62, %v502_v61 }
 0x165   : > { %506 = vst [vmem:[%s189_s6 + $0x1] sm:$0x1] %v504_v63 }
 0x166   : > { %898 = shalt.err (!%p895_p13)
}
 0x167   : > { %s899_s27 = scalar_lea.hbm %s1148_s10, 32  ;;  %s903_s26 = scalar_lea.hbm %s1194_s3, 64 }
 0x168   : > { %p900_p1 = scmp.ne.s32.totalorder %s1148_s10, %s899_s27  ;;  %p904_p6 = scmp.lt.u32.totalorder %s1148_s10, %s1194_s3 }
 0x169   : > { %p905_p10 = scmp.lt.u32.totalorder %s903_s26, %s899_s27  ;;  %p907_p2 = scmp.lt.u32.totalorder %s899_s27, %s1148_s10 }
 0x16a   : > { %p901_p0 = pnand %p900_p1, %p1205_p9 }
 0x16b   : > { %p906_p12 = por %p905_p10, %p904_p6 }
 0x16c   : > { %p902_p5 = pneg %p901_p0 }
 0x16d   : > { %p908_p3 = por %p907_p2, %p906_p12 }
 0x16f   : > { %p909_p4 = pnand %p908_p3, %p902_p5 }
 0x171   : > { %912 = shalt.err (!%p909_p4)
}
 0x172   : > { %755 = dma.vmem_to_hbm [thread:$0]  (%p1205_p9), %s1150_s7, 32, %s1148_s10, %s513_s11  }
 0x173 PF: > { %p771_p7 = scmp.ge.s32.totalorder %s955_s15, 2  ;;  %s554_s4 = sand.u32 1, %s943_s12  }
 0x174   : > { %p1206_p8 = scmp.ne.s32.totalorder %s1199_s23, 0  ;;  %s555_s5 = scalar_lea.sflag [#allocation4], %s554_s4 }
 0x176   : > { %p763_p11 = pnand %p771_p7, %p1206_p8 }
 0x178   : > { %934 = dma.done.wait (!%p763_p11), %s555_s5, 256  }
 0x179   : > { %936 = vsyncadd (!%p763_p11), %s555_s5, 4294967040  ;;  %s564_s6 = scalar_lea.sflag [#allocation7], %s554_s4 }
 0x17a   : > { %938 = dma.done.wait (!%p763_p11), %s564_s6, 32  }
 0x17b   : > { %940 = vsyncadd (!%p763_p11), %s564_s6, 4294967264  ;;  %p18_p9 = scmp.ge.s32.totalorder %s1011_s18, 4   ;;  %s1207_s12 = smov %s947_s13 }
 0x17c   : > { %s1208_s13 = smov %s951_s14  ;;  %s1209_s14 = smov %s1022_s21 }
 0x17d   : > { %s1210_s15 = smov %s1011_s18  ;;  %20 = sbr.rel (!%p18_p9) target bundleno = 6 (0x6), region = 87 }
 0x184   :  { %569 = vsyncpa [#allocation3], 1 }
 0x185   :  { %571 = vsyncpa [#allocation3 + $0x1], 1 }
 0x186   :  { %572 = vsyncpa [#allocation4], 1 }
 0x187   :  { %574 = vsyncpa [#allocation4 + $0x1], 1 }
 0x188   :  { %575 = vsyncpa [#allocation7], 1 }
 0x189   :  { %577 = vsyncpa [#allocation7 + $0x1], 1 }

</bundles_post_ra>
